<compile_context>
chip_gen: v6e
topology: v6e:2x2x1
jax: 0.10.0
libtpu: 0.0.40
codegen_flags: <defaults>
</compile_context>

<pallas_src>
import functools

import jax
import jax.numpy as jnp
import numpy as np
from jax import lax
from jax.experimental import pallas as pl
from jax.experimental.pallas import tpu as pltpu


def _round_up(x, m):
    return (x + m - 1) // m * m


# ----------------------------- fused ResidualBlock kernel -----------------------------
def _residual_kernel(x_ref, w1_ref, b1_ref, w2_ref, b2_ref, ws_ref, bs_ref, o_ref, *, H, W):
    # x_ref : (1, Cp_in, N)      f32, channels on sublanes, N = H*W on lanes
    # w1_ref: (Cp_mid, 9*Cp_in)  bf16, flattened HWIO taps, (kh, kw, cin)-major columns
    # w2_ref: (Cout,  9*Cp_mid)  bf16
    # ws_ref: (Cout, Cp_in)      bf16, 1x1 shortcut conv
    # b*_ref: (*, 1)             f32 biases (padded rows are zero)
    # o_ref : (1, Cout, N)       lane-dense output (N = 256, multiple of 128)
    N = H * W
    x = x_ref[0]                                              # (Cp_in, N)

    # Border masks for SAME padding, built once and shared by both convs.
    n = lax.broadcasted_iota(jnp.int32, (1, N), 1)            # lane index -> n = h*W + w
    col = n % W
    not_left = col != 0                                        # tap dw = -1 invalid at w == 0
    not_right = col != (W - 1)                                 # tap dw = +1 invalid at w == W-1
    not_top = n >= W                                           # tap dh = -1 invalid at h == 0
    not_bot = n < (H - 1) * W                                  # tap dh = +1 invalid at h == H-1

    def im2col_3x3(a):
        # a: (C, N) -> (9*C, N); row order (kh, kw, c) matches the flattened HWIO weight.
        # Shift along the lane axis (XLU roll) and zero out-of-bounds halo positions.
        rows = []
        for dh in (-1, 0, 1):
            for dw in (-1, 0, 1):
                d = dh * W + dw
                shifted = a if d == 0 else pltpu.roll(a, shift=(-d) % N, axis=1)
                mask = None
                for m in ((not_top if dh == -1 else not_bot if dh == 1 else None),
                          (not_left if dw == -1 else not_right if dw == 1 else None)):
                    if m is not None:
                        mask = m if mask is None else (mask & m)
                rows.append(shifted if mask is None else jnp.where(mask, shifted, 0.0))
        return jnp.concatenate(rows, axis=0)                   # sublane-aligned (C % 8 == 0)

    # conv1: 3x3, Cin -> Cmid (padded to 8):  h1 = W1 @ im2col(silu(x)) + b1
    p1 = im2col_3x3(jax.nn.silu(x))                            # (9*Cp_in, N)
    h1 = jnp.dot(w1_ref[...], p1.astype(jnp.bfloat16),
                 preferred_element_type=jnp.float32) + b1_ref[...]   # (Cp_mid, N)

    # conv2: 3x3, Cmid -> Cout:  h2 = W2 @ im2col(silu(h1)) + b2
    # padded rows of h1 are exactly 0 (zero weights + zero bias) and silu(0) = 0.
    p2 = im2col_3x3(jax.nn.silu(h1))                           # (9*Cp_mid, N)
    h2 = jnp.dot(w2_ref[...], p2.astype(jnp.bfloat16),
                 preferred_element_type=jnp.float32) + b2_ref[...]   # (Cout, N)

    # shortcut: 1x1 conv on the un-activated input
    sc = jnp.dot(ws_ref[...], x.astype(jnp.bfloat16),
                 preferred_element_type=jnp.float32) + bs_ref[...]   # (Cout, N)

    o_ref[0] = (h2 + sc).astype(o_ref.dtype)                   # single lane-dense store


# ----------------------------- wrapper -----------------------------
def residual_block_forward(x_nchw, p):
    """ResidualBlock forward. x: (B, Cin, H, W) NCHW -> (B, Cout, H, W) NCHW."""
    B, Cin, H, W = x_nchw.shape
    Cout = p["ws"].shape[0]
    N = H * W
    Cp_in = _round_up(Cin, 8)     # sublane-align channel dims
    Cp_mid = _round_up(Cout, 8)

    # NCHW is already channel-major: (B, Cin, H, W) -> (B, Cin, N) is a free reshape.
    x = x_nchw.reshape(B, Cin, N)
    if Cp_in != Cin:              # no-op for Cin=8
        x = jnp.pad(x, ((0, 0), (0, Cp_in - Cin), (0, 0)))

    # Hoisted weight prep: HWIO (3,3,Ci,Co) -> (Co_pad, 9*Ci_pad) bf16, zero-padded channels.
    def flat3x3(w, ci_pad, co_pad):
        _, _, ci, co = w.shape
        w = jnp.pad(w, ((0, 0), (0, 0), (0, ci_pad - ci), (0, co_pad - co)))
        return w.reshape(9 * ci_pad, co_pad).T.astype(jnp.bfloat16)

    w1f = flat3x3(p["w1"], Cp_in, Cp_mid)                                   # (Cp_mid, 9*Cp_in)
    w2f = flat3x3(p["w2"], Cp_mid, Cout)                                    # (Cout, 9*Cp_mid)
    b1p = jnp.pad(p["b1"], ((0, Cp_mid - Cout), (0, 0)))                    # (Cp_mid, 1)
    wsf = jnp.pad(p["ws"], ((0, 0), (0, Cp_in - Cin))).astype(jnp.bfloat16)  # (Cout, Cp_in)

    kernel = functools.partial(_residual_kernel, H=H, W=W)
    out = pl.pallas_call(
        kernel,
        out_shape=jax.ShapeDtypeStruct((B, Cout, N), jnp.float32),
        grid_spec=pltpu.PrefetchScalarGridSpec(
            num_scalar_prefetch=0,
            grid=(B,),
            in_specs=[
                pl.BlockSpec((1, Cp_in, N), lambda b: (b, 0, 0)),
                pl.BlockSpec((Cp_mid, 9 * Cp_in), lambda b: (0, 0)),
                pl.BlockSpec((Cp_mid, 1), lambda b: (0, 0)),
                pl.BlockSpec((Cout, 9 * Cp_mid), lambda b: (0, 0)),
                pl.BlockSpec((Cout, 1), lambda b: (0, 0)),
                pl.BlockSpec((Cout, Cp_in), lambda b: (0, 0)),
                pl.BlockSpec((Cout, 1), lambda b: (0, 0)),
            ],
            out_specs=pl.BlockSpec((1, Cout, N), lambda b: (b, 0, 0)),
        ),
        compiler_params=pltpu.CompilerParams(dimension_semantics=("parallel",)),
    )(x, w1f, b1p, w2f, p["b2"], wsf, p["bs"])
    return out.reshape(B, Cout, H, W)


def init_params(key, cin, cout):
    ks = jax.random.split(key, 6)
    s = 0.1
    return dict(
        w1=jax.random.normal(ks[0], (3, 3, cin, cout), jnp.float32) * s,    # conv1, HWIO
        b1=jax.random.normal(ks[1], (cout, 1), jnp.float32) * s,
        w2=jax.random.normal(ks[2], (3, 3, cout, cout), jnp.float32) * s,   # conv2, HWIO
        b2=jax.random.normal(ks[3], (cout, 1), jnp.float32) * s,
        ws=jax.random.normal(ks[4], (cout, cin), jnp.float32) * s,          # 1x1 shortcut
        bs=jax.random.normal(ks[5], (cout, 1), jnp.float32) * s,
    )


# ----------------------------- pure-JAX reference -----------------------------
def ref_forward(x_nchw, p):
    x = jnp.transpose(x_nchw, (0, 2, 3, 1))                                 # NHWC
    dn = ("NHWC", "HWIO", "NHWC")
    h = lax.conv_general_dilated(jax.nn.silu(x), p["w1"], (1, 1), "SAME",
                                 dimension_numbers=dn) + p["b1"][:, 0]
    h = lax.conv_general_dilated(jax.nn.silu(h), p["w2"], (1, 1), "SAME",
                                 dimension_numbers=dn) + p["b2"][:, 0]
    sc = jnp.einsum("bhwc,dc->bhwd", x, p["ws"]) + p["bs"][:, 0]
    return jnp.transpose(h + sc, (0, 3, 1, 2))


if __name__ == "__main__":
    key = jax.random.PRNGKey(0)
    kx, kp = jax.random.split(key)
    # in_channels=8 (U-Net skip concat of 4+4), out_channels=4 -> conv shortcut path exercised.
    in_ch, out_ch, B, H, W = 8, 4, 2, 16, 16
    x = jax.random.normal(kx, (B, in_ch, H, W), jnp.float32)                # NCHW
    params = init_params(kp, in_ch, out_ch)

    fwd = jax.jit(residual_block_forward)
    y = jax.block_until_ready(fwd(x, params))

    y_ref = ref_forward(x, params)
    np.testing.assert_allclose(np.asarray(y), np.asarray(y_ref), rtol=2e-2, atol=2e-2)
    assert y.shape == (B, out_ch, H, W)
    print("KERNEL_OK")
</pallas_src>

<mosaic_0001>
module attributes {stable_mosaic.version = 11 : i64} {
  func.func @_residual_kernel(%arg0: i32, %arg1: memref<1x8x256xf32, #tpu.memory_space<vmem>>, %arg2: memref<8x72xbf16, #tpu.memory_space<vmem>>, %arg3: memref<8x1xf32, #tpu.memory_space<vmem>>, %arg4: memref<4x72xbf16, #tpu.memory_space<vmem>>, %arg5: memref<4x1xf32, #tpu.memory_space<vmem>>, %arg6: memref<4x8xbf16, #tpu.memory_space<vmem>>, %arg7: memref<4x1xf32, #tpu.memory_space<vmem>>, %arg8: memref<1x4x256xf32, #tpu.memory_space<vmem>>) attributes {dimension_semantics = [#tpu.dimension_semantics<parallel>], iteration_bounds = array<i64: 2>, scalar_prefetch = 0 : i64, scratch_operands = 0 : i64, tpu.core_type = #tpu.core_type<tc>, window_params = [{transform_indices = @transform_0, window_bounds = array<i64: 1, 8, 256>}, {pipeline_mode = #tpu.pipeline_mode<synchronous>, transform_indices = @transform_1, window_bounds = array<i64: 8, 72>}, {pipeline_mode = #tpu.pipeline_mode<synchronous>, transform_indices = @transform_2, window_bounds = array<i64: 8, 1>}, {pipeline_mode = #tpu.pipeline_mode<synchronous>, transform_indices = @transform_3, window_bounds = array<i64: 4, 72>}, {pipeline_mode = #tpu.pipeline_mode<synchronous>, transform_indices = @transform_4, window_bounds = array<i64: 4, 1>}, {pipeline_mode = #tpu.pipeline_mode<synchronous>, transform_indices = @transform_5, window_bounds = array<i64: 4, 8>}, {pipeline_mode = #tpu.pipeline_mode<synchronous>, transform_indices = @transform_6, window_bounds = array<i64: 4, 1>}, {transform_indices = @transform_7, window_bounds = array<i64: 1, 4, 256>}]} {
    %c0 = arith.constant 0 : index
    %c0_0 = arith.constant 0 : index
    %c0_1 = arith.constant 0 : index
    %0 = vector.load %arg1[%c0, %c0_0, %c0_1] : memref<1x8x256xf32, #tpu.memory_space<vmem>>, vector<1x8x256xf32>
    %1 = vector.shape_cast %0 : vector<1x8x256xf32> to vector<8x256xf32>
    %2 = tpu.iota {dimensions = array<i32: 1>} : vector<1x256xi32>
    %c16_i32 = arith.constant 16 : i32
    %c0_i32 = arith.constant 0 : i32
    %3 = arith.cmpi eq, %c16_i32, %c0_i32 : i32
    %c1_i32 = arith.constant 1 : i32
    %4 = arith.select %3, %c1_i32, %c16_i32 : i32
    %5 = vector.broadcast %4 : i32 to vector<1x256xi32>
    %6 = arith.remsi %2, %5 : vector<1x256xi32>
    %c0_i32_2 = arith.constant 0 : i32
    %7 = vector.broadcast %c0_i32_2 : i32 to vector<1x256xi32>
    %8 = arith.cmpi ne, %6, %7 : vector<1x256xi32>
    %c0_i32_3 = arith.constant 0 : i32
    %9 = vector.broadcast %c0_i32_3 : i32 to vector<1x256xi32>
    %10 = arith.cmpi slt, %6, %9 : vector<1x256xi32>
    %c0_i32_4 = arith.constant 0 : i32
    %11 = arith.cmpi slt, %4, %c0_i32_4 : i32
    %12 = vector.broadcast %11 : i1 to vector<1x256xi1>
    %13 = vector.broadcast %12 : vector<1x256xi1> to vector<1x256xi1>
    %14 = arith.xori %10, %13 : vector<1x256xi1>
    %15 = arith.andi %14, %8 : vector<1x256xi1>
    %16 = vector.broadcast %4 : i32 to vector<1x256xi32>
    %17 = arith.addi %6, %16 : vector<1x256xi32>
    %18 = arith.select %15, %17, %6 : vector<1x256xi1>, vector<1x256xi32>
    %c0_i32_5 = arith.constant 0 : i32
    %19 = vector.broadcast %c0_i32_5 : i32 to vector<1x256xi32>
    %20 = arith.cmpi ne, %18, %19 : vector<1x256xi32>
    %c15_i32 = arith.constant 15 : i32
    %21 = vector.broadcast %c15_i32 : i32 to vector<1x256xi32>
    %22 = arith.cmpi ne, %18, %21 : vector<1x256xi32>
    %c16_i32_6 = arith.constant 16 : i32
    %23 = vector.broadcast %c16_i32_6 : i32 to vector<1x256xi32>
    %24 = arith.cmpi sge, %2, %23 : vector<1x256xi32>
    %c240_i32 = arith.constant 240 : i32
    %25 = vector.broadcast %c240_i32 : i32 to vector<1x256xi32>
    %26 = arith.cmpi slt, %2, %25 : vector<1x256xi32>
    %27 = arith.negf %1 : vector<8x256xf32>
    %28 = math.exp %27 : vector<8x256xf32>
    %cst = arith.constant 1.000000e+00 : f32
    %29 = vector.broadcast %cst : f32 to vector<8x256xf32>
    %30 = arith.addf %29, %28 : vector<8x256xf32>
    %31 = arith.divf %29, %30 : vector<8x256xf32>
    %32 = arith.mulf %1, %31 : vector<8x256xf32>
    %c17_i32 = arith.constant 17 : i32
    %33 = tpu.dynamic_rotate %32 by %c17_i32 dim 1 : vector<8x256xf32>, i32 -> vector<8x256xf32>
    %34 = arith.andi %24, %20 : vector<1x256xi1>
    %cst_7 = arith.constant 0.000000e+00 : f32
    %35 = vector.shape_cast %34 : vector<1x256xi1> to vector<1x256xi1>
    %36 = vector.broadcast %35 : vector<1x256xi1> to vector<8x256xi1>
    %37 = vector.broadcast %cst_7 : f32 to vector<8x256xf32>
    %38 = arith.select %36, %33, %37 : vector<8x256xi1>, vector<8x256xf32>
    %c16_i32_8 = arith.constant 16 : i32
    %39 = tpu.dynamic_rotate %32 by %c16_i32_8 dim 1 : vector<8x256xf32>, i32 -> vector<8x256xf32>
    %cst_9 = arith.constant 0.000000e+00 : f32
    %40 = vector.shape_cast %24 : vector<1x256xi1> to vector<1x256xi1>
    %41 = vector.broadcast %40 : vector<1x256xi1> to vector<8x256xi1>
    %42 = vector.broadcast %cst_9 : f32 to vector<8x256xf32>
    %43 = arith.select %41, %39, %42 : vector<8x256xi1>, vector<8x256xf32>
    %c15_i32_10 = arith.constant 15 : i32
    %44 = tpu.dynamic_rotate %32 by %c15_i32_10 dim 1 : vector<8x256xf32>, i32 -> vector<8x256xf32>
    %45 = arith.andi %24, %22 : vector<1x256xi1>
    %cst_11 = arith.constant 0.000000e+00 : f32
    %46 = vector.shape_cast %45 : vector<1x256xi1> to vector<1x256xi1>
    %47 = vector.broadcast %46 : vector<1x256xi1> to vector<8x256xi1>
    %48 = vector.broadcast %cst_11 : f32 to vector<8x256xf32>
    %49 = arith.select %47, %44, %48 : vector<8x256xi1>, vector<8x256xf32>
    %c1_i32_12 = arith.constant 1 : i32
    %50 = tpu.dynamic_rotate %32 by %c1_i32_12 dim 1 : vector<8x256xf32>, i32 -> vector<8x256xf32>
    %cst_13 = arith.constant 0.000000e+00 : f32
    %51 = vector.shape_cast %20 : vector<1x256xi1> to vector<1x256xi1>
    %52 = vector.broadcast %51 : vector<1x256xi1> to vector<8x256xi1>
    %53 = vector.broadcast %cst_13 : f32 to vector<8x256xf32>
    %54 = arith.select %52, %50, %53 : vector<8x256xi1>, vector<8x256xf32>
    %c255_i32 = arith.constant 255 : i32
    %55 = tpu.dynamic_rotate %32 by %c255_i32 dim 1 : vector<8x256xf32>, i32 -> vector<8x256xf32>
    %cst_14 = arith.constant 0.000000e+00 : f32
    %56 = vector.shape_cast %22 : vector<1x256xi1> to vector<1x256xi1>
    %57 = vector.broadcast %56 : vector<1x256xi1> to vector<8x256xi1>
    %58 = vector.broadcast %cst_14 : f32 to vector<8x256xf32>
    %59 = arith.select %57, %55, %58 : vector<8x256xi1>, vector<8x256xf32>
    %c241_i32 = arith.constant 241 : i32
    %60 = tpu.dynamic_rotate %32 by %c241_i32 dim 1 : vector<8x256xf32>, i32 -> vector<8x256xf32>
    %61 = arith.andi %26, %20 : vector<1x256xi1>
    %cst_15 = arith.constant 0.000000e+00 : f32
    %62 = vector.shape_cast %61 : vector<1x256xi1> to vector<1x256xi1>
    %63 = vector.broadcast %62 : vector<1x256xi1> to vector<8x256xi1>
    %64 = vector.broadcast %cst_15 : f32 to vector<8x256xf32>
    %65 = arith.select %63, %60, %64 : vector<8x256xi1>, vector<8x256xf32>
    %c240_i32_16 = arith.constant 240 : i32
    %66 = tpu.dynamic_rotate %32 by %c240_i32_16 dim 1 : vector<8x256xf32>, i32 -> vector<8x256xf32>
    %cst_17 = arith.constant 0.000000e+00 : f32
    %67 = vector.shape_cast %26 : vector<1x256xi1> to vector<1x256xi1>
    %68 = vector.broadcast %67 : vector<1x256xi1> to vector<8x256xi1>
    %69 = vector.broadcast %cst_17 : f32 to vector<8x256xf32>
    %70 = arith.select %68, %66, %69 : vector<8x256xi1>, vector<8x256xf32>
    %c239_i32 = arith.constant 239 : i32
    %71 = tpu.dynamic_rotate %32 by %c239_i32 dim 1 : vector<8x256xf32>, i32 -> vector<8x256xf32>
    %72 = arith.andi %26, %22 : vector<1x256xi1>
    %cst_18 = arith.constant 0.000000e+00 : f32
    %73 = vector.shape_cast %72 : vector<1x256xi1> to vector<1x256xi1>
    %74 = vector.broadcast %73 : vector<1x256xi1> to vector<8x256xi1>
    %75 = vector.broadcast %cst_18 : f32 to vector<8x256xf32>
    %76 = arith.select %74, %71, %75 : vector<8x256xi1>, vector<8x256xf32>
    %77 = tpu.concatenate %38, %43, %49, %54, %32, %59, %65, %70, %76 in 0 : vector<8x256xf32>, vector<8x256xf32>, vector<8x256xf32>, vector<8x256xf32>, vector<8x256xf32>, vector<8x256xf32>, vector<8x256xf32>, vector<8x256xf32>, vector<8x256xf32> -> vector<72x256xf32>
    %c0_19 = arith.constant 0 : index
    %c0_20 = arith.constant 0 : index
    %78 = vector.load %arg2[%c0_19, %c0_20] : memref<8x72xbf16, #tpu.memory_space<vmem>>, vector<8x72xbf16>
    %79 = arith.truncf %77 : vector<72x256xf32> to vector<72x256xbf16>
    %cst_21 = arith.constant dense<0.000000e+00> : vector<8x256xf32>
    %80 = tpu.matmul %78, %79, %cst_21 {dimension_numbers = #tpu.dot_dimension_numbers<[1], [0], [0], [1], [0, 0, 1, 1], [], []>} : vector<8x72xbf16>, vector<72x256xbf16>, vector<8x256xf32> -> vector<8x256xf32>
    %c0_22 = arith.constant 0 : index
    %c0_23 = arith.constant 0 : index
    %81 = vector.load %arg3[%c0_22, %c0_23] : memref<8x1xf32, #tpu.memory_space<vmem>>, vector<8x1xf32>
    %82 = vector.broadcast %81 : vector<8x1xf32> to vector<8x256xf32>
    %83 = arith.addf %80, %82 : vector<8x256xf32>
    %84 = arith.negf %83 : vector<8x256xf32>
    %85 = math.exp %84 : vector<8x256xf32>
    %cst_24 = arith.constant 1.000000e+00 : f32
    %86 = vector.broadcast %cst_24 : f32 to vector<8x256xf32>
    %87 = arith.addf %86, %85 : vector<8x256xf32>
    %88 = arith.divf %86, %87 : vector<8x256xf32>
    %89 = arith.mulf %83, %88 : vector<8x256xf32>
    %c17_i32_25 = arith.constant 17 : i32
    %90 = tpu.dynamic_rotate %89 by %c17_i32_25 dim 1 : vector<8x256xf32>, i32 -> vector<8x256xf32>
    %91 = arith.andi %24, %20 : vector<1x256xi1>
    %cst_26 = arith.constant 0.000000e+00 : f32
    %92 = vector.shape_cast %91 : vector<1x256xi1> to vector<1x256xi1>
    %93 = vector.broadcast %92 : vector<1x256xi1> to vector<8x256xi1>
    %94 = vector.broadcast %cst_26 : f32 to vector<8x256xf32>
    %95 = arith.select %93, %90, %94 : vector<8x256xi1>, vector<8x256xf32>
    %c16_i32_27 = arith.constant 16 : i32
    %96 = tpu.dynamic_rotate %89 by %c16_i32_27 dim 1 : vector<8x256xf32>, i32 -> vector<8x256xf32>
    %cst_28 = arith.constant 0.000000e+00 : f32
    %97 = vector.shape_cast %24 : vector<1x256xi1> to vector<1x256xi1>
    %98 = vector.broadcast %97 : vector<1x256xi1> to vector<8x256xi1>
    %99 = vector.broadcast %cst_28 : f32 to vector<8x256xf32>
    %100 = arith.select %98, %96, %99 : vector<8x256xi1>, vector<8x256xf32>
    %c15_i32_29 = arith.constant 15 : i32
    %101 = tpu.dynamic_rotate %89 by %c15_i32_29 dim 1 : vector<8x256xf32>, i32 -> vector<8x256xf32>
    %102 = arith.andi %24, %22 : vector<1x256xi1>
    %cst_30 = arith.constant 0.000000e+00 : f32
    %103 = vector.shape_cast %102 : vector<1x256xi1> to vector<1x256xi1>
    %104 = vector.broadcast %103 : vector<1x256xi1> to vector<8x256xi1>
    %105 = vector.broadcast %cst_30 : f32 to vector<8x256xf32>
    %106 = arith.select %104, %101, %105 : vector<8x256xi1>, vector<8x256xf32>
    %c1_i32_31 = arith.constant 1 : i32
    %107 = tpu.dynamic_rotate %89 by %c1_i32_31 dim 1 : vector<8x256xf32>, i32 -> vector<8x256xf32>
    %cst_32 = arith.constant 0.000000e+00 : f32
    %108 = vector.shape_cast %20 : vector<1x256xi1> to vector<1x256xi1>
    %109 = vector.broadcast %108 : vector<1x256xi1> to vector<8x256xi1>
    %110 = vector.broadcast %cst_32 : f32 to vector<8x256xf32>
    %111 = arith.select %109, %107, %110 : vector<8x256xi1>, vector<8x256xf32>
    %c255_i32_33 = arith.constant 255 : i32
    %112 = tpu.dynamic_rotate %89 by %c255_i32_33 dim 1 : vector<8x256xf32>, i32 -> vector<8x256xf32>
    %cst_34 = arith.constant 0.000000e+00 : f32
    %113 = vector.shape_cast %22 : vector<1x256xi1> to vector<1x256xi1>
    %114 = vector.broadcast %113 : vector<1x256xi1> to vector<8x256xi1>
    %115 = vector.broadcast %cst_34 : f32 to vector<8x256xf32>
    %116 = arith.select %114, %112, %115 : vector<8x256xi1>, vector<8x256xf32>
    %c241_i32_35 = arith.constant 241 : i32
    %117 = tpu.dynamic_rotate %89 by %c241_i32_35 dim 1 : vector<8x256xf32>, i32 -> vector<8x256xf32>
    %118 = arith.andi %26, %20 : vector<1x256xi1>
    %cst_36 = arith.constant 0.000000e+00 : f32
    %119 = vector.shape_cast %118 : vector<1x256xi1> to vector<1x256xi1>
    %120 = vector.broadcast %119 : vector<1x256xi1> to vector<8x256xi1>
    %121 = vector.broadcast %cst_36 : f32 to vector<8x256xf32>
    %122 = arith.select %120, %117, %121 : vector<8x256xi1>, vector<8x256xf32>
    %c240_i32_37 = arith.constant 240 : i32
    %123 = tpu.dynamic_rotate %89 by %c240_i32_37 dim 1 : vector<8x256xf32>, i32 -> vector<8x256xf32>
    %cst_38 = arith.constant 0.000000e+00 : f32
    %124 = vector.shape_cast %26 : vector<1x256xi1> to vector<1x256xi1>
    %125 = vector.broadcast %124 : vector<1x256xi1> to vector<8x256xi1>
    %126 = vector.broadcast %cst_38 : f32 to vector<8x256xf32>
    %127 = arith.select %125, %123, %126 : vector<8x256xi1>, vector<8x256xf32>
    %c239_i32_39 = arith.constant 239 : i32
    %128 = tpu.dynamic_rotate %89 by %c239_i32_39 dim 1 : vector<8x256xf32>, i32 -> vector<8x256xf32>
    %129 = arith.andi %26, %22 : vector<1x256xi1>
    %cst_40 = arith.constant 0.000000e+00 : f32
    %130 = vector.shape_cast %129 : vector<1x256xi1> to vector<1x256xi1>
    %131 = vector.broadcast %130 : vector<1x256xi1> to vector<8x256xi1>
    %132 = vector.broadcast %cst_40 : f32 to vector<8x256xf32>
    %133 = arith.select %131, %128, %132 : vector<8x256xi1>, vector<8x256xf32>
    %134 = tpu.concatenate %95, %100, %106, %111, %89, %116, %122, %127, %133 in 0 : vector<8x256xf32>, vector<8x256xf32>, vector<8x256xf32>, vector<8x256xf32>, vector<8x256xf32>, vector<8x256xf32>, vector<8x256xf32>, vector<8x256xf32>, vector<8x256xf32> -> vector<72x256xf32>
    %c0_41 = arith.constant 0 : index
    %c0_42 = arith.constant 0 : index
    %135 = vector.load %arg4[%c0_41, %c0_42] : memref<4x72xbf16, #tpu.memory_space<vmem>>, vector<4x72xbf16>
    %136 = arith.truncf %134 : vector<72x256xf32> to vector<72x256xbf16>
    %cst_43 = arith.constant dense<0.000000e+00> : vector<4x256xf32>
    %137 = tpu.matmul %135, %136, %cst_43 {dimension_numbers = #tpu.dot_dimension_numbers<[1], [0], [0], [1], [0, 0, 1, 1], [], []>} : vector<4x72xbf16>, vector<72x256xbf16>, vector<4x256xf32> -> vector<4x256xf32>
    %c0_44 = arith.constant 0 : index
    %c0_45 = arith.constant 0 : index
    %138 = vector.load %arg5[%c0_44, %c0_45] : memref<4x1xf32, #tpu.memory_space<vmem>>, vector<4x1xf32>
    %139 = vector.broadcast %138 : vector<4x1xf32> to vector<4x256xf32>
    %140 = arith.addf %137, %139 : vector<4x256xf32>
    %c0_46 = arith.constant 0 : index
    %c0_47 = arith.constant 0 : index
    %141 = vector.load %arg6[%c0_46, %c0_47] : memref<4x8xbf16, #tpu.memory_space<vmem>>, vector<4x8xbf16>
    %142 = arith.truncf %1 : vector<8x256xf32> to vector<8x256xbf16>
    %cst_48 = arith.constant dense<0.000000e+00> : vector<4x256xf32>
    %143 = tpu.matmul %141, %142, %cst_48 {dimension_numbers = #tpu.dot_dimension_numbers<[1], [0], [0], [1], [0, 0, 1, 1], [], []>} : vector<4x8xbf16>, vector<8x256xbf16>, vector<4x256xf32> -> vector<4x256xf32>
    %c0_49 = arith.constant 0 : index
    %c0_50 = arith.constant 0 : index
    %144 = vector.load %arg7[%c0_49, %c0_50] : memref<4x1xf32, #tpu.memory_space<vmem>>, vector<4x1xf32>
    %145 = vector.broadcast %144 : vector<4x1xf32> to vector<4x256xf32>
    %146 = arith.addf %143, %145 : vector<4x256xf32>
    %147 = arith.addf %140, %146 : vector<4x256xf32>
    %c0_51 = arith.constant 0 : index
    %c0_52 = arith.constant 0 : index
    %c0_53 = arith.constant 0 : index
    %148 = vector.load %arg8[%c0_51, %c0_52, %c0_53] : memref<1x4x256xf32, #tpu.memory_space<vmem>>, vector<1x4x256xf32>
    %149 = vector.shape_cast %148 : vector<1x4x256xf32> to vector<4x256xf32>
    %150 = vector.shape_cast %147 : vector<4x256xf32> to vector<1x4x256xf32>
    tpu.vector_store %arg8[%c0_51, %c0_52, %c0_53], %150 {strides = array<i32>} : memref<1x4x256xf32, #tpu.memory_space<vmem>>, vector<1x4x256xf32>,
    return
  }
  func.func @transform_0(%arg0: i32) -> (i32, i32, i32) {
    %c0_i32 = arith.constant 0 : i32
    %c0_i32_0 = arith.constant 0 : i32
    %c0_i32_1 = arith.constant 0 : i32
    return %arg0, %c0_i32, %c0_i32_0 : i32, i32, i32
  }
  func.func @transform_1(%arg0: i32) -> (i32, i32) {
    %c0_i32 = arith.constant 0 : i32
    %c0_i32_0 = arith.constant 0 : i32
    %c0_i32_1 = arith.constant 0 : i32
    return %c0_i32, %c0_i32_0 : i32, i32
  }
  func.func @transform_2(%arg0: i32) -> (i32, i32) {
    %c0_i32 = arith.constant 0 : i32
    %c0_i32_0 = arith.constant 0 : i32
    %c0_i32_1 = arith.constant 0 : i32
    return %c0_i32, %c0_i32_0 : i32, i32
  }
  func.func @transform_3(%arg0: i32) -> (i32, i32) {
    %c0_i32 = arith.constant 0 : i32
    %c0_i32_0 = arith.constant 0 : i32
    %c0_i32_1 = arith.constant 0 : i32
    return %c0_i32, %c0_i32_0 : i32, i32
  }
  func.func @transform_4(%arg0: i32) -> (i32, i32) {
    %c0_i32 = arith.constant 0 : i32
    %c0_i32_0 = arith.constant 0 : i32
    %c0_i32_1 = arith.constant 0 : i32
    return %c0_i32, %c0_i32_0 : i32, i32
  }
  func.func @transform_5(%arg0: i32) -> (i32, i32) {
    %c0_i32 = arith.constant 0 : i32
    %c0_i32_0 = arith.constant 0 : i32
    %c0_i32_1 = arith.constant 0 : i32
    return %c0_i32, %c0_i32_0 : i32, i32
  }
  func.func @transform_6(%arg0: i32) -> (i32, i32) {
    %c0_i32 = arith.constant 0 : i32
    %c0_i32_0 = arith.constant 0 : i32
    %c0_i32_1 = arith.constant 0 : i32
    return %c0_i32, %c0_i32_0 : i32, i32
  }
  func.func @transform_7(%arg0: i32) -> (i32, i32, i32) {
    %c0_i32 = arith.constant 0 : i32
    %c0_i32_0 = arith.constant 0 : i32
    %c0_i32_1 = arith.constant 0 : i32
    return %arg0, %c0_i32, %c0_i32_0 : i32, i32, i32
  }
}

</mosaic_0001>

<bundles_post_ra>
// kernel: residual_block_forward.1
= control target key start
LH: loop header
LB: loop body
LE: loop exit
PB: predicated region body
PF: predicated region fallthrough
CT: control target
= control target key end

     0   :  { %s1024_s24 = smov 0   ;;  %s1334_s0 = inlined_call_operand.vmem [shape: f32[2,8,256], index: 0, kind: input, shape index: {}]   ;;  %s1335_s1 = inlined_call_operand.vmem [shape: bf16[8,72], index: 1, kind: input, shape index: {}]   ;;  %s1336_s2 = inlined_call_operand.vmem [shape: f32[8,1], index: 2, kind: input, shape index: {}]   ;;  %s1337_s3 = inlined_call_operand.vmem [shape: bf16[4,72], index: 3, kind: input, shape index: {}]   ;;  %s1338_s4 = inlined_call_operand.vmem [shape: f32[4,1], index: 4, kind: input, shape index: {}]   ;;  %s1339_s5 = inlined_call_operand.vmem [shape: bf16[4,8], index: 5, kind: input, shape index: {}]   ;;  %s1340_s6 = inlined_call_operand.vmem [shape: f32[4,1], index: 6, kind: input, shape index: {}]   ;;  %s1341_s7 = inlined_call_operand.vmem [shape: f32[2,4,256], index: 7, kind: output, shape index: {}]  }
   0x1 LB: > { %s779_s25 = sadd.s32 4294967295, %s972_s24   ;;  %p783_p0 = scmp.ge.s32.totalorder %s972_s24, 1  ;;  %s972_s24 = sphi %s1024_s24, %s17_s24  }
   0x2   : > { %p237_p1 = scmp.lt.s32.totalorder %s972_s24, 3 }
   0x4   : > { %p238_p2 = pnand %p783_p0, %p237_p1 }
   0x5   : > { %p269_p3 = scmp.lt.s32.totalorder (!%p238_p2), %s779_s25, 1  ;;  %s974_s30 = smov (!%p238_p2), 111  }
   0x6   : > { %241 = sbr.rel (%p238_p2) target bundleno = 769 (0x301), region = 48  ;;  %s975_s8 = smov (!%p238_p2), 112  }
   0x7   : > { %s976_s9 = smov (!%p238_p2), 113   ;;  %s977_s10 = smov (!%p238_p2), 127  }
   0x8   : > { %s978_s11 = smov (!%p238_p2), 1   ;;  %s979_s12 = smov (!%p238_p2), 15  }
   0x9   : > { %s981_s13 = smov (!%p238_p2), 16   ;;  %s982_s14 = smov (!%p238_p2), 17  }
   0xb   : > { %s1405_s25 = smov (!%p269_p3, %s779_s25), 1  ;;  %v980_v13 = vmov 0   ;;  %v454_v14 = vld [vmem:[%s1336_s2] sm:$0xff]  ;;  %v282_v15 = vlaneseq  ;;  %vm1348_vm8 = vcmask 1043456   ;;  %vm983_vm15 = vmmov 1  }
   0xc   : > { %s848_s26 = sshll.u32 %s1405_s25, 4  ;;  %503 = vmatprep.mubr.bf16.mxu0 %v980_v13  ;;  %908 = vset.pattern.permute.xlu0 %v980_v13 }
   0xd   : > { %s273_s29 = scalar_lea.vmem %s1334_s0, %s848_s26  ;;  %648 = vmatprep.mubr.bf16.mxu1 %v980_v13  ;;  %949 = vset.pattern.permute.xlu1 %v980_v13  ;;  %v1067_v16 = vand.u32 127, %v282_v15 }
   0xe   : > { %v1038_v0 = vld [vmem:[%s273_s29] sm:$0xff]  ;;  %v1040_v1 = vld [vmem:[%s273_s29 + $0x8] sm:$0xff]  ;;  %s849_s29 = sshll.u32 %s1405_s25, 3 }
   0xf   : > { %v788_v2 = vmul.f32 -1.442695, %v1038_v0  ;;  %v789_v3 = vmul.f32 -1.442695, %v1040_v1  ;;  %v284_v17 = vadd.s32 128, %v1067_v16  ;;  %v289_v19 = vand.u32 15, %v1067_v16 }
  0x10   : > { %vm1344_vm2 = vcmp.lt.s32.totalorder %v1067_v16, 112  ;;  %vm1345_vm3 = vcmp.lt.s32.totalorder %v1067_v16, 111  ;;  %vm1343_vm7 = vcmp.lt.s32.totalorder %v1067_v16, 113  ;;  %vm1342_vm9 = vcmp.lt.s32.totalorder %v1067_v16, 127 }
  0x11   : > { %950 = vpow2.f32 %v788_v2  ;;  %v296_v18 = vand.u32 15, %v284_v17  ;;  %vm316_vm1 = vcmp.lt.s32.totalorder %v284_v17, 240  ;;  %vm1077_vm4 = vcmp.ne.s32.totalorder %v289_v19, 15 }
  0x12   : > { %952 = vpow2.f32 %v789_v3  ;;  %vm1109_vm11 = vcmp.ne.s32.totalorder %v289_v19, 0  ;;  %vm1346_vm13 = vcmp.lt.s32.totalorder %v1067_v16, 1  ;;  %vm1347_vm14 = vcmp.lt.s32.totalorder %v1067_v16, 15 }
  0x13   : > { %vm1071_vm0 = vcmp.ne.s32.totalorder %v296_v18, 15  ;;  %vm1081_vm5 = vcmp.ne.s32.totalorder %v296_v18, 0 }
  0x14   : > { %vm1088_vm6 = vmand %vm316_vm1, %vm1071_vm0 }
  0x15   : > { %vm408_vm10 = vmand %vm316_vm1, %vm1081_vm5 }
  0x16   : > { %vm1120_vm12 = vmpackc.low %vm316_vm1, %vm408_vm10 }
  0x17   : > { %vm1134_vm1 = vmpackc.low %vm983_vm15, %vm1109_vm11 }
  0x18   : > { %vm1143_vm10 = vmpackc.low %vm1071_vm0, %vm983_vm15 }
  0x1e   : > { %v951_v4 = vpop.eup %950 }
  0x1f   : > { %v953_v5 = vpop.eup %952  ;;  %v323_v6 = vadd.f32 1.0, %v951_v4 }
  0x20   : > { %v324_v7 = vadd.f32 1.0, %v953_v5 }
  0x21   : > { %954 = vrcp.f32 %v323_v6 }
  0x22   : > { %956 = vrcp.f32 %v324_v7 }
  0x2e   : > { %v955_v8 = vpop.eup %954 }
  0x2f   : > { %v957_v9 = vpop.eup %956  ;;  %v1045_v10 = vmul.f32 %v955_v8, %v1038_v0 }
  0x30   : > { %v1048_v11 = vmul.f32 %v957_v9, %v1040_v1 }
  0x32   : > { %v868_v12 = vpack.i.bf16 %v1048_v11, %v1045_v10 }
  0x34   : > { %869 = vrot.lane.b32.xlu0 %v868_v12, %s974_s30  ;;  %879 = vrot.lane.b32.xlu1 %v868_v12, %s975_s8 }
  0x38   : > { %874 = vrot.lane.b32.xlu0 %v868_v12, %s976_s9  ;;  %884 = vrot.lane.b32.xlu1 %v868_v12, %s977_s10 }
  0x3c   : > { %894 = vrot.lane.b32.xlu1 %v868_v12, %s978_s11  ;;  %889 = vrot.lane.b32.xlu0 %v868_v12, %s979_s12 }
  0x40   : > { %904 = vrot.lane.b32.xlu1 %v868_v12, %s981_s13  ;;  %899 = vrot.lane.b32.xlu0 %v868_v12, %s982_s14 }
  0x44   : > { %457 = vperm.xlu0 %908, %v454_v14  }
  0xa6   : > { %v870_v21 = vpop.permute.xlu0 %869  ;;  %v880_v22 = vpop.permute.xlu1 %879 }
  0xa7   : > { %v872_v25 = vunpack.i.h.bf16 %v870_v21  ;;  %v871_v26 = vunpack.i.l.bf16 %v870_v21  ;;  %v882_v27 = vunpack.i.h.bf16 %v880_v22  ;;  %v881_v28 = vunpack.i.l.bf16 %v880_v22 }
  0xa9   : > { %v434_v30 = vsel %vm1345_vm3, %v872_v25, %v871_v26  ;;  %v433_v31 = vsel %vm1345_vm3, %v871_v26, %v872_v25  ;;  %v420_v32 = vsel %vm1344_vm2, %v881_v28, %v882_v27  ;;  %v421_v33 = vsel %vm1344_vm2, %v882_v27, %v881_v28  ;;  %vm1161_vm2 = vmpackc.low %vm1077_vm4, %vm983_vm15  ;;  %v443_v28 = vld [vmem:[%s1335_s1] sm:$0xf] }
  0xaa   : > { %v875_v34 = vpop.permute.xlu0 %874  ;;  %v442_v35 = vsel %vm1088_vm6, %v434_v30, 0.0  ;;  %v441_v36 = vsel %vm1077_vm4, %v433_v31, 0.0  ;;  %v885_v37 = vpop.permute.xlu1 %884  ;;  %vm1351_vm3 = vcmp.lt.s32.totalorder %v1067_v16, 17 }
  0xab   : > { %v877_v38 = vunpack.i.h.bf16 %v875_v34  ;;  %v876_v39 = vunpack.i.l.bf16 %v875_v34  ;;  %v453_v40 = vpack.c.bf16 %v442_v35, %v442_v35  ;;  %v452_v41 = vpack.c.bf16 %v441_v36, %v441_v36 }
  0xac   : > { %v887_v42 = vunpack.i.h.bf16 %v885_v37  ;;  %v886_v43 = vunpack.i.l.bf16 %v885_v37 }
  0xad   : > { %v405_v45 = vsel %vm1343_vm7, %v876_v39, %v877_v38  ;;  %v406_v46 = vsel %vm1343_vm7, %v877_v38, %v876_v39  ;;  %790 = vmatprep.subr.msk.bf16.mxu0 %vm1348_vm8, %v453_v40  ;;  %v466_v47 = vsel %vm1348_vm8, %v452_v41, 0  ;;  %vm1350_vm7 = vcmp.lt.s32.totalorder %v1067_v16, 16 }
  0xae   : > { %v792_v49 = vpack.c.bf16 %v421_v33, %v406_v46  ;;  %v795_v50 = vpack.c.bf16 %v420_v32, %v405_v45  ;;  %478 = vmatpush1.bf16.msra.mxu0 %v466_v47  ;;  %v393_v51 = vsel %vm1342_vm9, %v887_v42, %v886_v43  ;;  %v895_v52 = vpop.permute.xlu1 %894  ;;  %v890_v53 = vpop.permute.xlu0 %889  ;;  %v392_v54 = vsel %vm1342_vm9, %v886_v43, %v887_v42 }
  0xaf   : > { %v798_v55 = vpack.c.bf16 %v393_v51, %v1048_v11  ;;  %v897_v57 = vunpack.i.h.bf16 %v895_v52  ;;  %v896_v58 = vunpack.i.l.bf16 %v895_v52  ;;  %v892_v59 = vunpack.i.h.bf16 %v890_v53  ;;  %v657_v52 = vld [vmem:[%s1339_s5] sm:$0x3] }
  0xb0   : > { %793 = vmatprep.subr.msk.bf16.mxu0 %vm1120_vm12, %v792_v49  ;;  %v891_v60 = vunpack.i.l.bf16 %v890_v53  ;;  %vm1349_vm9 = vcmp.ge.s32.totalorder %v1067_v16, 16  ;;  %v801_v63 = vpack.c.bf16 %v392_v54, %v1045_v10  ;;  %v659_v49 = vpack.c.bf16 %v1040_v1, %v1040_v1  ;;  %v660_v1 = vld [vmem:[%s1340_s6] sm:$0xf] }
  0xb1   : > { %v379_v62 = vsel %vm1346_vm13, %v896_v58, %v897_v57  ;;  %v380_v2 = vsel %vm1346_vm13, %v897_v57, %v896_v58  ;;  %vm1174_vm13 = vmand %vm1349_vm9, %vm1077_vm4 }
  0xb2   : > { %796 = vmatpush1.bf16.msk.msra.mxu0 %vm1134_vm1, %v795_v50  ;;  %v364_v3 = vsel %vm1347_vm14, %v891_v60, %v892_v59  ;;  %v905_v5 = vpop.permute.xlu1 %904  ;;  %v900_v6 = vpop.permute.xlu0 %899  ;;  %v365_v7 = vsel %vm1347_vm14, %v892_v59, %v891_v60  ;;  %vm1352_vm14 = vmpackc.low %vm1081_vm5, %vm1071_vm0  ;;  %v658_v50 = vpack.c.bf16 %v1038_v0, %v1038_v0  ;;  %v601_v0 = vld [vmem:[%s1338_s4] sm:$0xf] }
  0xb3   : > { %v804_v8 = vpack.c.bf16 %v379_v62, %v364_v3  ;;  %799 = vmatprep.subr.msk.bf16.mxu0 %vm1143_vm10, %v798_v55  ;;  %v907_v9 = vunpack.i.h.bf16 %v905_v5  ;;  %v906_v10 = vunpack.i.l.bf16 %v905_v5  ;;  %v902_v12 = vunpack.i.h.bf16 %v900_v6  ;;  %vm1204_vm9 = vmpackc.low %vm983_vm15, %vm1081_vm5 }
  0xb4   : > { %v901_v14 = vunpack.i.l.bf16 %v900_v6  ;;  %v807_v17 = vpack.c.bf16 %v380_v2, %v365_v7 }
  0xb5   : > { %v351_v15 = vsel %vm1350_vm7, %v906_v10, %v907_v9  ;;  %v352_v19 = vsel %vm1350_vm7, %v907_v9, %v906_v10  ;;  %vm1376_vm7 = vcmp.ge.s32.totalorder %v1067_v16, 16 }
  0xb6   : > { %802 = vmatpush1.bf16.msk.msra.mxu0 %vm1161_vm2, %v801_v63  ;;  %v336_v18 = vsel %vm1351_vm3, %v901_v14, %v902_v12  ;;  %v337_v21 = vsel %vm1351_vm3, %v902_v12, %v901_v14  ;;  %vm338_vm8 = vmand %vm1376_vm7, %vm1109_vm11 }
  0xb7   : > { %v810_v22 = vpack.c.bf16 %v351_v15, %v336_v18  ;;  %805 = vmatprep.subr.msk.bf16.mxu0 %vm1352_vm14, %v804_v8  ;;  %v813_v26 = vpack.c.bf16 %v352_v19, %v337_v21  ;;  %vm1377_vm3 = vmpackc.low %vm1109_vm11, %vm1174_vm13 }
  0xb8   : > { %vm1378_vm15 = vmmov %vm1376_vm7  ;;  %vm1353_vm7 = vcmask 588800  }
  0xb9   : > { %vm1221_vm14 = vmpackc.low %vm1378_vm15, %vm338_vm8  ;;  %vm666_vm15 = vcmask 64512  }
  0xba   : > { %808 = vmatpush1.bf16.msk.msra.mxu0 %vm1377_vm3, %v807_v17  ;;  %vm1381_vm3 = vcmask 1043456  }
  0xbb   : > { %811 = vmatprep.subr.msk.bf16.mxu0 %vm1204_vm9, %v810_v22  ;;  %v671_v51 = vsel %vm1381_vm3, %v658_v50, 0  ;;  %vm1382_vm8 = vmmov %vm1381_vm3  ;;  %vm1383_vm3 = vcmp.lt.s32.totalorder %v1067_v16, 111 }
  0xbe   : > { %814 = vmatpush1.bf16.msk.msra.mxu0 %vm1221_vm14, %v813_v26 }
  0xbf   : > { %v458_v30 = vpop.permute.xlu0 %457  ;;  %844 = vmatprep.subr.msk.bf16.mxu0 %vm1382_vm8, %v659_v49  ;;  %vm1384_vm8 = vmmov %vm1383_vm3  ;;  %v590_v49 = vld [vmem:[%s1337_s3] sm:$0x3] }
  0xc1   : > { %815 = vmatmul.mubr.msk.bf16.vlgmr.msra.gmra.mxu0 %vm1353_vm7, %v443_v28  ;;  %vm1388_vm7 = vcmask 1043456  }
  0xc2   : > { %708 = vmatprep.mubr.bf16.mxu0 %v980_v13  ;;  %691 = vmatpush1.bf16.msra.mxu0 %v671_v51 }
  0xc9   : > { %845 = vmatmul.mubr.msk.bf16.vlgmr.msra.gmra.mxu0 %vm666_vm15, %v657_v52  ;;  %vm1385_vm15 = vcmp.lt.s32.totalorder %v1067_v16, 112 }
 0x181   : > { %v505_v31 = vpop.f32.mrf.mxu0 }
 0x182   : > { %v506_v32 = vadd.f32 %v505_v31, %v458_v30 }
 0x183   : > { %v507_v33 = vpop.f32.mrf.mxu0 }
 0x184   : > { %v816_v34 = vmul.f32 -1.442695, %v506_v32  ;;  %v508_v35 = vadd.f32 %v507_v33, %v458_v30 }
 0x185   : > { %v509_v36 = vpop.f32.mrf.mxu0 }
 0x186   : > { %958 = vpow2.f32 %v816_v34  ;;  %v817_v37 = vmul.f32 -1.442695, %v508_v35 }
 0x187   : > { %v510_v38 = vpop.f32.mrf.mxu0 }
 0x188   : > { %960 = vpow2.f32 %v817_v37 }
 0x189   : > { %v710_v44 = vpop.f32.mrf.mxu0 }
 0x18b   : > { %v712_v11 = vpop.f32.mrf.mxu0 }
 0x18d   : > { %v714_v50 = vpop.f32.mrf.mxu0 }
 0x18f   : > { %v715_v51 = vpop.f32.mrf.mxu0 }
 0x193   : > { %v959_v39 = vpop.eup %958 }
 0x194   : > { %v518_v40 = vadd.f32 1.0, %v959_v39 }
 0x195   : > { %v961_v41 = vpop.eup %960 }
 0x196   : > { %962 = vrcp.f32 %v518_v40  ;;  %v519_v42 = vadd.f32 1.0, %v961_v41 }
 0x198   : > { %964 = vrcp.f32 %v519_v42 }
 0x1a3   : > { %v963_v43 = vpop.eup %962 }
 0x1a4   : > { %v1232_v13 = vmul.f32 %v963_v43, %v506_v32 }
 0x1a5   : > { %v965_v45 = vpop.eup %964 }
 0x1a6   : > { %v1234_v46 = vmul.f32 %v965_v45, %v508_v35 }
 0x1a8   : > { %v919_v47 = vpack.i.bf16 %v1234_v46, %v1232_v13 }
 0x1aa   : > { %920 = vrot.lane.b32.xlu0 %v919_v47, %s975_s8  ;;  %910 = vrot.lane.b32.xlu1 %v919_v47, %s974_s30 }
 0x1ae   : > { %930 = vrot.lane.b32.xlu0 %v919_v47, %s979_s12  ;;  %915 = vrot.lane.b32.xlu1 %v919_v47, %s976_s9  ;;  %s278_s9 = scalar_lea.vmem %s1341_s7, %s849_s29 }
 0x1b2   : > { %940 = vrot.lane.b32.xlu0 %v919_v47, %s982_s14  ;;  %925 = vrot.lane.b32.xlu1 %v919_v47, %s977_s10 }
 0x1b6   : > { %604 = vperm.xlu0 %908, %v601_v0   ;;  %935 = vrot.lane.b32.xlu1 %v919_v47, %s978_s11 }
 0x1ba   : > { %945 = vrot.lane.b32.xlu1 %v919_v47, %s981_s13 }
 0x1be   : > { %663 = vperm.xlu1 %949, %v660_v1  }
 0x21c   : > { %v921_v53 = vpop.permute.xlu0 %920  ;;  %v911_v54 = vpop.permute.xlu1 %910 }
 0x21d   : > { %v913_v55 = vunpack.i.h.bf16 %v911_v54  ;;  %v912_v57 = vunpack.i.l.bf16 %v911_v54  ;;  %v923_v58 = vunpack.i.h.bf16 %v921_v53  ;;  %v922_v59 = vunpack.i.l.bf16 %v921_v53 }
 0x21f   : > { %v587_v60 = vsel %vm1383_vm3, %v913_v55, %v912_v57  ;;  %v586_v62 = vsel %vm1384_vm8, %v912_v57, %v913_v55  ;;  %v579_v10 = vsel %vm1385_vm15, %v923_v58, %v922_v59  ;;  %vm1386_vm3 = vcmp.lt.s32.totalorder %v1067_v16, 113 }
 0x220   : > { %v916_v63 = vpop.permute.xlu1 %915  ;;  %v589_v2 = vsel %vm1088_vm6, %v587_v60, 0.0  ;;  %v588_v3 = vsel %vm1077_vm4, %v586_v62, 0.0  ;;  %v931_v7 = vpop.permute.xlu0 %930  ;;  %vm1387_vm8 = vmmov %vm1386_vm3 }
 0x221   : > { %v918_v5 = vunpack.i.h.bf16 %v916_v63  ;;  %v917_v6 = vunpack.i.l.bf16 %v916_v63  ;;  %v600_v8 = vpack.c.bf16 %v589_v2, %v589_v2  ;;  %v599_v9 = vpack.c.bf16 %v588_v3, %v588_v3  ;;  %vm1389_vm6 = vmmov %vm1388_vm7 }
 0x222   : > { %vm1390_vm4 = vmmov %vm1385_vm15  ;;  %v933_v21 = vunpack.i.h.bf16 %v931_v7  ;;  %v932_v22 = vunpack.i.l.bf16 %v931_v7  ;;  %vm1391_vm15 = vcmp.lt.s32.totalorder %v1067_v16, 127 }
 0x223   : > { %v571_v12 = vsel %vm1386_vm3, %v918_v5, %v917_v6  ;;  %v570_v14 = vsel %vm1387_vm8, %v917_v6, %v918_v5  ;;  %818 = vmatprep.subr.msk.bf16.mxu1 %vm1388_vm7, %v600_v8  ;;  %v611_v23 = vsel %vm1389_vm6, %v599_v9, 0  ;;  %v578_v19 = vsel %vm1390_vm4, %v922_v59, %v923_v58  ;;  %vm1392_vm7 = vmmov %vm1391_vm15 }
 0x224   : > { %v820_v15 = vpack.c.bf16 %v579_v10, %v571_v12  ;;  %v926_v29 = vpop.permute.xlu1 %925  ;;  %623 = vmatpush1.bf16.msra.mxu1 %v611_v23  ;;  %v823_v26 = vpack.c.bf16 %v578_v19, %v570_v14  ;;  %v941_v30 = vpop.permute.xlu0 %940  ;;  %vm1393_vm3 = vcmp.lt.s32.totalorder %v1067_v16, 15  ;;  %vm1398_vm6 = vcmp.lt.s32.totalorder %v1067_v16, 17 }
 0x225   : > { %v928_v17 = vunpack.i.h.bf16 %v926_v29  ;;  %v927_v18 = vunpack.i.l.bf16 %v926_v29  ;;  %v546_v48 = vsel %vm1393_vm3, %v932_v22, %v933_v21  ;;  %v943_v36 = vunpack.i.h.bf16 %v941_v30 }
 0x226   : > { %821 = vmatprep.subr.msk.bf16.mxu1 %vm1120_vm12, %v820_v15  ;;  %v942_v37 = vunpack.i.l.bf16 %v941_v30  ;;  %vm1394_vm12 = vcmp.lt.s32.totalorder %v1067_v16, 1  ;;  %vm1399_vm4 = vcmp.lt.s32.totalorder %v1067_v16, 16 }
 0x227   : > { %v563_v28 = vsel %vm1391_vm15, %v928_v17, %v927_v18  ;;  %v562_v31 = vsel %vm1392_vm7, %v927_v18, %v928_v17  ;;  %vm1395_vm8 = vmmov %vm1394_vm12 }
 0x228   : > { %v826_v32 = vpack.c.bf16 %v563_v28, %v1234_v46  ;;  %v936_v33 = vpop.permute.xlu1 %935  ;;  %824 = vmatpush1.bf16.msk.msra.mxu1 %vm1134_vm1, %v823_v26  ;;  %v829_v38 = vpack.c.bf16 %v562_v31, %v1232_v13  ;;  %vm1396_vm1 = vmmov %vm1393_vm3  ;;  %v530_v45 = vsel %vm1398_vm6, %v942_v37, %v943_v36 }
 0x229   : > { %v938_v34 = vunpack.i.h.bf16 %v936_v33  ;;  %v937_v35 = vunpack.i.l.bf16 %v936_v33  ;;  %v547_v61 = vsel %vm1396_vm1, %v933_v21, %v932_v22  ;;  %vm1400_vm15 = vmmov %vm1399_vm4 }
 0x22a   : > { %827 = vmatprep.subr.msk.bf16.mxu1 %vm1143_vm10, %v826_v32  ;;  %vm1397_vm10 = vmpackc.low %vm1081_vm5, %vm1071_vm0  ;;  %vm1403_vm5 = vcmask 588800  }
 0x22b   : > { %v554_v39 = vsel %vm1394_vm12, %v937_v35, %v938_v34  ;;  %v555_v40 = vsel %vm1395_vm8, %v938_v34, %v937_v35  ;;  %vm1402_vm0 = vmmov %vm1398_vm6 }
 0x22c   : > { %v832_v41 = vpack.c.bf16 %v554_v39, %v546_v48  ;;  %v946_v42 = vpop.permute.xlu1 %945  ;;  %830 = vmatpush1.bf16.msk.msra.mxu1 %vm1161_vm2, %v829_v38  ;;  %v835_v13 = vpack.c.bf16 %v555_v40, %v547_v61  ;;  %vm1401_vm2 = vmpackc.low %vm1109_vm11, %vm1174_vm13  ;;  %v531_v20 = vsel %vm1402_vm0, %v943_v36, %v942_v37 }
 0x22d   : > { %v948_v56 = vunpack.i.h.bf16 %v946_v42  ;;  %v947_v43 = vunpack.i.l.bf16 %v946_v42 }
 0x22e   : > { %833 = vmatprep.subr.msk.bf16.mxu1 %vm1397_vm10, %v832_v41 }
 0x22f   : > { %v538_v46 = vsel %vm1399_vm4, %v947_v43, %v948_v56  ;;  %v539_v4 = vsel %vm1400_vm15, %v948_v56, %v947_v43 }
 0x230   : > { %v838_v47 = vpack.c.bf16 %v538_v46, %v530_v45  ;;  %836 = vmatpush1.bf16.msk.msra.mxu1 %vm1401_vm2, %v835_v13  ;;  %v841_v24 = vpack.c.bf16 %v539_v4, %v531_v20 }
 0x231   : > { %v605_v52 = vpop.permute.xlu0 %604 }
 0x232   : > { %839 = vmatprep.subr.msk.bf16.mxu1 %vm1204_vm9, %v838_v47 }
 0x234   : > { %842 = vmatpush1.bf16.msk.msra.mxu1 %vm1221_vm14, %v841_v24 }
 0x237   : > { %843 = vmatmul.mubr.msk.bf16.vlgmr.msra.gmra.mxu1 %vm1403_vm5, %v590_v49 }
 0x239   : > { %v664_v16 = vpop.permute.xlu1 %663 }
 0x23a   : > { %v711_v25 = vadd.f32 %v710_v44, %v664_v16  ;;  %v713_v54 = vadd.f32 %v712_v11, %v664_v16 }
 0x2f7   : > { %v650_v0 = vpop.f32.mrf.mxu1 }
 0x2f8   : > { %v651_v1 = vadd.f32 %v650_v0, %v605_v52 }
 0x2f9   : > { %v652_v53 = vpop.f32.mrf.mxu1 }
 0x2fa   : > { %v653_v27 = vadd.f32 %v652_v53, %v605_v52  ;;  %v717_v57 = vadd.f32 %v711_v25, %v651_v1 }
 0x2fb   : > { %v654_v55 = vpop.f32.mrf.mxu1 }
 0x2fc   : > { %v718_v58 = vadd.f32 %v713_v54, %v653_v27 }
 0x2fd   : > { %v655_v59 = vpop.f32.mrf.mxu1 }
 0x2fe   : > { %v721_v60 = vcombine.low %v717_v57, %v718_v58 }
 0x300   : > { %723 = vst [vmem:[%s278_s9] sm:$0xff] %v721_v60 }
 0x301 PF: > { %s17_s24 = sadd.s32 1, %s972_s24  }
 0x302   : > { %p14_p4 = scmp.ge.s32.totalorder %s17_s24, 4  }
 0x304   :  { %16 = sbr.rel (!%p14_p4) target bundleno = 1 (0x1), region = 78 }

</bundles_post_ra>
